<compile_context>
chip_gen: v7x
topology: tpu7x:2x2x1
jax: 0.10.0
libtpu: 0.0.40
codegen_flags: <defaults>
</compile_context>

<pallas_src>
import jax
import jax.numpy as jnp
from jax.experimental import pallas as pl
from jax.experimental.pallas import tpu as pltpu


def mlp_kernel(x_ref,
               w1_ref, b1_ref,
               w2_ref, b2_ref,
               w3_ref, b3_ref,
               w4_ref, b4_ref,
               o_ref):
    """One batch tile of the fused MLP forward, batch-on-lanes layout.

    x_ref  : (16, TB)  bf16   features on sublanes, batch on lanes
    w1_ref : (128, 16) bf16   b1_ref : (128, 1) f32
    w2_ref : (64, 128) bf16   b2_ref : (64, 1)  f32
    w3_ref : (32, 64)  bf16   b3_ref : (32, 1)  f32
    w4_ref : (32, 1)   f32    final layer as a column for the VPU/XLU reduce
    b4_ref : (1,)      f32    scalar bias in SMEM
    o_ref  : (1, TB)   f32    lane-dense output row
    """
    x = x_ref[...]

    h1 = jnp.dot(w1_ref[...], x, preferred_element_type=jnp.float32) + b1_ref[...]
    h1 = jnp.maximum(h1, 0.0)                        # (128, TB) f32 epilogue (v5e-safe)

    h2 = jnp.dot(w2_ref[...], h1.astype(jnp.bfloat16),
                 preferred_element_type=jnp.float32) + b2_ref[...]
    h2 = jnp.maximum(h2, 0.0)                        # (64, TB)

    h3 = jnp.dot(w3_ref[...], h2.astype(jnp.bfloat16),
                 preferred_element_type=jnp.float32) + b3_ref[...]
    h3 = jnp.maximum(h3, 0.0)                        # (32, TB)

    # Final layer has output width 1: a matmul would waste the MXU, so do a
    # broadcast multiply (VPU) + sublane reduce (XLU) straight into the
    # lane-dense (1, TB) output row.
    out = jnp.sum(h3 * w4_ref[...], axis=0, keepdims=True) + b4_ref[0]
    o_ref[...] = out.astype(o_ref.dtype)


def _choose_batch_tile(batch, block_batch):
    """Batch tile (lane axis): multiple of 128; >= 2 grid steps when possible."""
    block_batch = max(128, (block_batch // 128) * 128)
    if batch > block_batch:
        return block_batch
    if batch > 128:
        # Split into >= 2 tiles so v7x's 2 TensorCores both get work
        # (no-op cost on v5e/v6e, which have a single TC).
        half = pl.cdiv(batch, 2)
        return pl.cdiv(half, 128) * 128
    return 128


def neural_net_forward(x, params, *, block_batch=2048):
    """Pallas forward. x: (batch, in_features) f32. Returns (batch, 1) f32."""
    (w1, b1), (w2, b2), (w3, b3), (w4, b4) = params   # torch layout: W (out,in), b (out,)
    batch, in_features = x.shape

    tb = _choose_batch_tile(batch, block_batch)
    padded = pl.cdiv(batch, tb) * tb

    # transpose + bf16 cast + pad fuse into one XLA pass -> (in, padded) bf16 slab
    xt = x.T.astype(jnp.bfloat16)
    if padded != batch:
        xt = jnp.pad(xt, ((0, 0), (0, padded - batch)))

    # Kernel-friendly parameter layout / dtypes.
    w1k, w2k, w3k = (w.astype(jnp.bfloat16) for w in (w1, w2, w3))
    b1c, b2c, b3c = (b.astype(jnp.float32).reshape(-1, 1) for b in (b1, b2, b3))
    w4col = w4.astype(jnp.float32).reshape(-1, 1)      # (32, 1)
    b4s = b4.astype(jnp.float32).reshape((1,))         # scalar -> SMEM

    def const_spec(a):  # weights/biases: DMA'd once, VMEM-resident across steps
        return pl.BlockSpec(a.shape, lambda i: (0, 0))

    out = pl.pallas_call(
        mlp_kernel,
        out_shape=jax.ShapeDtypeStruct((1, padded), jnp.float32),
        grid=(padded // tb,),
        in_specs=[
            pl.BlockSpec((in_features, tb), lambda i: (0, i)),
            const_spec(w1k), const_spec(b1c),
            const_spec(w2k), const_spec(b2c),
            const_spec(w3k), const_spec(b3c),
            const_spec(w4col),
            pl.BlockSpec(memory_space=pltpu.MemorySpace.SMEM),
        ],
        out_specs=pl.BlockSpec((1, tb), lambda i: (0, i)),
        compiler_params=pltpu.CompilerParams(
            dimension_semantics=("parallel",),
            vmem_limit_bytes=32 * 1024 * 1024),
    )(xt, w1k, b1c, w2k, b2c, w3k, b3c, w4col, b4s)

    return out[0, :batch].reshape(batch, 1)


def init_linear_params(key, in_features, out_features):
    """torch.nn.Linear-style init: W (out, in), b (out,), U(-k, k), k=1/sqrt(in)."""
    kw, kb = jax.random.split(key)
    bound = 1.0 / jnp.sqrt(jnp.float32(in_features))
    w = jax.random.uniform(kw, (out_features, in_features), jnp.float32,
                           minval=-bound, maxval=bound)
    b = jax.random.uniform(kb, (out_features,), jnp.float32,
                           minval=-bound, maxval=bound)
    return w, b


def init_params(key, input_size):
    k1, k2, k3, k4 = jax.random.split(key, 4)
    return (
        init_linear_params(k1, input_size, 128),
        init_linear_params(k2, 128, 64),
        init_linear_params(k3, 64, 32),
        init_linear_params(k4, 32, 1),
    )


def reference_forward_mixed(x, params):
    """Pure-JAX reference mirroring the kernel's bf16-operand / f32-accum math
    in the same transposed orientation."""
    (w1, b1), (w2, b2), (w3, b3), (w4, b4) = params
    bf = jnp.bfloat16
    xt = x.T.astype(bf)                                              # (16, B)
    h = jnp.maximum(jnp.dot(w1.astype(bf), xt,
                            preferred_element_type=jnp.float32) + b1[:, None], 0.0)
    h = jnp.maximum(jnp.dot(w2.astype(bf), h.astype(bf),
                            preferred_element_type=jnp.float32) + b2[:, None], 0.0)
    h = jnp.maximum(jnp.dot(w3.astype(bf), h.astype(bf),
                            preferred_element_type=jnp.float32) + b3[:, None], 0.0)
    out = jnp.sum(h * w4.reshape(-1, 1), axis=0, keepdims=True) + b4  # (1, B)
    return out.T


def reference_forward_f32(x, params):
    """Full-precision reference (loose sanity check for the bf16 path)."""
    (w1, b1), (w2, b2), (w3, b3), (w4, b4) = params
    h = jnp.maximum(x @ w1.T + b1, 0.0)
    h = jnp.maximum(h @ w2.T + b2, 0.0)
    h = jnp.maximum(h @ w3.T + b3, 0.0)
    return h @ w4.T + b4


if __name__ == "__main__":
    key = jax.random.PRNGKey(0)
    k_x, k_x2, k_p = jax.random.split(key, 3)

    input_size = 16  # tabular feature count (X_train.shape[1] in the original script)
    params = init_params(k_p, input_size)

    # Small case (single grid step, batch padded up to one 128-lane tile).
    batch = 8
    x = jax.random.normal(k_x, (batch, input_size), dtype=jnp.float32)
    out = jax.block_until_ready(neural_net_forward(x, params))
    ref = reference_forward_mixed(x, params)
    ref_f32 = reference_forward_f32(x, params)
    assert out.shape == (batch, 1)
    assert jnp.allclose(out, ref, atol=2e-3, rtol=2e-3)
    assert jnp.allclose(out, ref_f32, atol=5e-2, rtol=5e-2)  # bf16 vs f32 drift

    # Larger case: exercises the >=2-step grid split, padding, and weight pinning.
    batch2 = 300
    x2 = jax.random.normal(k_x2, (batch2, input_size), dtype=jnp.float32)
    out2 = jax.block_until_ready(neural_net_forward(x2, params))
    ref2 = reference_forward_mixed(x2, params)
    assert out2.shape == (batch2, 1)
    assert jnp.allclose(out2, ref2, atol=2e-3, rtol=2e-3)

    print("KERNEL_OK")
</pallas_src>

<mosaic_0001>
module attributes {stable_mosaic.version = 11 : i64} {
  func.func @mlp_kernel(%arg0: i32, %arg1: memref<16x128xbf16, #tpu.memory_space<vmem>>, %arg2: memref<128x16xbf16, #tpu.memory_space<vmem>>, %arg3: memref<128x1xf32, #tpu.memory_space<vmem>>, %arg4: memref<64x128xbf16, #tpu.memory_space<vmem>>, %arg5: memref<64x1xf32, #tpu.memory_space<vmem>>, %arg6: memref<32x64xbf16, #tpu.memory_space<vmem>>, %arg7: memref<32x1xf32, #tpu.memory_space<vmem>>, %arg8: memref<32x1xf32, #tpu.memory_space<vmem>>, %arg9: memref<1xf32, #tpu.memory_space<smem>>, %arg10: memref<1x128xf32, #tpu.memory_space<vmem>>) attributes {dimension_semantics = [#tpu.dimension_semantics<parallel>], iteration_bounds = array<i64: 1>, scalar_prefetch = 0 : i64, scratch_operands = 0 : i64, tpu.core_type = #tpu.core_type<tc>, window_params = [{transform_indices = @transform_0, window_bounds = array<i64: 16, 128>}, {pipeline_mode = #tpu.pipeline_mode<synchronous>, transform_indices = @transform_1, window_bounds = array<i64: 128, 16>}, {pipeline_mode = #tpu.pipeline_mode<synchronous>, transform_indices = @transform_2, window_bounds = array<i64: 128, 1>}, {pipeline_mode = #tpu.pipeline_mode<synchronous>, transform_indices = @transform_3, window_bounds = array<i64: 64, 128>}, {pipeline_mode = #tpu.pipeline_mode<synchronous>, transform_indices = @transform_4, window_bounds = array<i64: 64, 1>}, {pipeline_mode = #tpu.pipeline_mode<synchronous>, transform_indices = @transform_5, window_bounds = array<i64: 32, 64>}, {pipeline_mode = #tpu.pipeline_mode<synchronous>, transform_indices = @transform_6, window_bounds = array<i64: 32, 1>}, {pipeline_mode = #tpu.pipeline_mode<synchronous>, transform_indices = @transform_7, window_bounds = array<i64: 32, 1>}, {transform_indices = @transform_8, window_bounds = array<i64: 1>}, {transform_indices = @transform_9, window_bounds = array<i64: 1, 128>}]} {
    %c0 = arith.constant 0 : index
    %c0_0 = arith.constant 0 : index
    %0 = vector.load %arg1[%c0, %c0_0] : memref<16x128xbf16, #tpu.memory_space<vmem>>, vector<16x128xbf16>
    %c0_1 = arith.constant 0 : index
    %c0_2 = arith.constant 0 : index
    %1 = vector.load %arg2[%c0_1, %c0_2] : memref<128x16xbf16, #tpu.memory_space<vmem>>, vector<128x16xbf16>
    %cst = arith.constant dense<0.000000e+00> : vector<128x128xf32>
    %2 = tpu.matmul %1, %0, %cst {dimension_numbers = #tpu.dot_dimension_numbers<[1], [0], [0], [1], [0, 0, 1, 1], [], []>} : vector<128x16xbf16>, vector<16x128xbf16>, vector<128x128xf32> -> vector<128x128xf32>
    %c0_3 = arith.constant 0 : index
    %c0_4 = arith.constant 0 : index
    %3 = vector.load %arg3[%c0_3, %c0_4] : memref<128x1xf32, #tpu.memory_space<vmem>>, vector<128x1xf32>
    %4 = vector.broadcast %3 : vector<128x1xf32> to vector<128x128xf32>
    %5 = arith.addf %2, %4 : vector<128x128xf32>
    %cst_5 = arith.constant 0.000000e+00 : f32
    %6 = vector.broadcast %cst_5 : f32 to vector<128x128xf32>
    %7 = arith.maximumf %5, %6 : vector<128x128xf32>
    %c0_6 = arith.constant 0 : index
    %c0_7 = arith.constant 0 : index
    %8 = vector.load %arg4[%c0_6, %c0_7] : memref<64x128xbf16, #tpu.memory_space<vmem>>, vector<64x128xbf16>
    %9 = arith.truncf %7 : vector<128x128xf32> to vector<128x128xbf16>
    %cst_8 = arith.constant dense<0.000000e+00> : vector<64x128xf32>
    %10 = tpu.matmul %8, %9, %cst_8 {dimension_numbers = #tpu.dot_dimension_numbers<[1], [0], [0], [1], [0, 0, 1, 1], [], []>} : vector<64x128xbf16>, vector<128x128xbf16>, vector<64x128xf32> -> vector<64x128xf32>
    %c0_9 = arith.constant 0 : index
    %c0_10 = arith.constant 0 : index
    %11 = vector.load %arg5[%c0_9, %c0_10] : memref<64x1xf32, #tpu.memory_space<vmem>>, vector<64x1xf32>
    %12 = vector.broadcast %11 : vector<64x1xf32> to vector<64x128xf32>
    %13 = arith.addf %10, %12 : vector<64x128xf32>
    %cst_11 = arith.constant 0.000000e+00 : f32
    %14 = vector.broadcast %cst_11 : f32 to vector<64x128xf32>
    %15 = arith.maximumf %13, %14 : vector<64x128xf32>
    %c0_12 = arith.constant 0 : index
    %c0_13 = arith.constant 0 : index
    %16 = vector.load %arg6[%c0_12, %c0_13] : memref<32x64xbf16, #tpu.memory_space<vmem>>, vector<32x64xbf16>
    %17 = arith.truncf %15 : vector<64x128xf32> to vector<64x128xbf16>
    %cst_14 = arith.constant dense<0.000000e+00> : vector<32x128xf32>
    %18 = tpu.matmul %16, %17, %cst_14 {dimension_numbers = #tpu.dot_dimension_numbers<[1], [0], [0], [1], [0, 0, 1, 1], [], []>} : vector<32x64xbf16>, vector<64x128xbf16>, vector<32x128xf32> -> vector<32x128xf32>
    %c0_15 = arith.constant 0 : index
    %c0_16 = arith.constant 0 : index
    %19 = vector.load %arg7[%c0_15, %c0_16] : memref<32x1xf32, #tpu.memory_space<vmem>>, vector<32x1xf32>
    %20 = vector.broadcast %19 : vector<32x1xf32> to vector<32x128xf32>
    %21 = arith.addf %18, %20 : vector<32x128xf32>
    %cst_17 = arith.constant 0.000000e+00 : f32
    %22 = vector.broadcast %cst_17 : f32 to vector<32x128xf32>
    %23 = arith.maximumf %21, %22 : vector<32x128xf32>
    %c0_18 = arith.constant 0 : index
    %c0_19 = arith.constant 0 : index
    %24 = vector.load %arg8[%c0_18, %c0_19] : memref<32x1xf32, #tpu.memory_space<vmem>>, vector<32x1xf32>
    %25 = vector.broadcast %24 : vector<32x1xf32> to vector<32x128xf32>
    %26 = arith.mulf %23, %25 : vector<32x128xf32>
    %cst_20 = arith.constant dense<0.000000e+00> : vector<128xf32>
    %27 = vector.multi_reduction <add>, %26, %cst_20 [0] : vector<32x128xf32> to vector<128xf32>
    %28 = vector.shape_cast %27 : vector<128xf32> to vector<1x128xf32>
    %c0_21 = arith.constant 0 : index
    %29 = memref.load %arg9[%c0_21] : memref<1xf32, #tpu.memory_space<smem>>
    %30 = vector.broadcast %29 : f32 to vector<1x128xf32>
    %31 = arith.addf %28, %30 : vector<1x128xf32>
    %c0_22 = arith.constant 0 : index
    %c0_23 = arith.constant 0 : index
    %32 = vector.load %arg10[%c0_22, %c0_23] : memref<1x128xf32, #tpu.memory_space<vmem>>, vector<1x128xf32>
    tpu.vector_store %arg10[%c0_22, %c0_23], %31 {strides = array<i32>} : memref<1x128xf32, #tpu.memory_space<vmem>>, vector<1x128xf32>,
    return
  }
  func.func @transform_0(%arg0: i32) -> (i32, i32) {
    %c0_i32 = arith.constant 0 : i32
    %c0_i32_0 = arith.constant 0 : i32
    return %c0_i32, %arg0 : i32, i32
  }
  func.func @transform_1(%arg0: i32) -> (i32, i32) {
    %c0_i32 = arith.constant 0 : i32
    %c0_i32_0 = arith.constant 0 : i32
    %c0_i32_1 = arith.constant 0 : i32
    return %c0_i32, %c0_i32_0 : i32, i32
  }
  func.func @transform_2(%arg0: i32) -> (i32, i32) {
    %c0_i32 = arith.constant 0 : i32
    %c0_i32_0 = arith.constant 0 : i32
    %c0_i32_1 = arith.constant 0 : i32
    return %c0_i32, %c0_i32_0 : i32, i32
  }
  func.func @transform_3(%arg0: i32) -> (i32, i32) {
    %c0_i32 = arith.constant 0 : i32
    %c0_i32_0 = arith.constant 0 : i32
    %c0_i32_1 = arith.constant 0 : i32
    return %c0_i32, %c0_i32_0 : i32, i32
  }
  func.func @transform_4(%arg0: i32) -> (i32, i32) {
    %c0_i32 = arith.constant 0 : i32
    %c0_i32_0 = arith.constant 0 : i32
    %c0_i32_1 = arith.constant 0 : i32
    return %c0_i32, %c0_i32_0 : i32, i32
  }
  func.func @transform_5(%arg0: i32) -> (i32, i32) {
    %c0_i32 = arith.constant 0 : i32
    %c0_i32_0 = arith.constant 0 : i32
    %c0_i32_1 = arith.constant 0 : i32
    return %c0_i32, %c0_i32_0 : i32, i32
  }
  func.func @transform_6(%arg0: i32) -> (i32, i32) {
    %c0_i32 = arith.constant 0 : i32
    %c0_i32_0 = arith.constant 0 : i32
    %c0_i32_1 = arith.constant 0 : i32
    return %c0_i32, %c0_i32_0 : i32, i32
  }
  func.func @transform_7(%arg0: i32) -> (i32, i32) {
    %c0_i32 = arith.constant 0 : i32
    %c0_i32_0 = arith.constant 0 : i32
    %c0_i32_1 = arith.constant 0 : i32
    return %c0_i32, %c0_i32_0 : i32, i32
  }
  func.func @transform_8(%arg0: i32) -> i32 {
    %c0_i32 = arith.constant 0 : i32
    %c0_i32_0 = arith.constant 0 : i32
    return %c0_i32 : i32
  }
  func.func @transform_9(%arg0: i32) -> (i32, i32) {
    %c0_i32 = arith.constant 0 : i32
    %c0_i32_0 = arith.constant 0 : i32
    return %c0_i32, %arg0 : i32, i32
  }
}

</mosaic_0001>

<bundles_post_ra>
// kernel: tpu_custom_call.1
= control target key start
LH: loop header
LB: loop body
LE: loop exit
PB: predicated region body
PF: predicated region fallthrough
CT: control target
= control target key end

     0   :  { %vm195_vm0 = vcmask 130048   ;;  %v800_v3 = vmov 0   ;;  %s1018_s0 = inlined_call_operand.vmem [shape: bf16[16,128], index: 0, kind: input, shape index: {}]   ;;  %s1019_s1 = inlined_call_operand.vmem [shape: bf16[128,16], index: 1, kind: input, shape index: {}]   ;;  %s1020_s2 = inlined_call_operand.vmem [shape: f32[128,1], index: 2, kind: input, shape index: {}]   ;;  %s1021_s3 = inlined_call_operand.vmem [shape: bf16[64,128], index: 3, kind: input, shape index: {}]   ;;  %s1022_s4 = inlined_call_operand.vmem [shape: f32[64,1], index: 4, kind: input, shape index: {}]   ;;  %s1023_s5 = inlined_call_operand.vmem [shape: bf16[32,64], index: 5, kind: input, shape index: {}]   ;;  %s1024_s6 = inlined_call_operand.vmem [shape: f32[32,1], index: 6, kind: input, shape index: {}]   ;;  %s1025_s7 = inlined_call_operand.vmem [shape: f32[32,1], index: 7, kind: input, shape index: {}]   ;;  %s1026_s8 = inlined_call_operand.<no memory space> [shape: f32[1], index: 8, kind: input, shape index: {}]   ;;  %s1027_s9 = inlined_call_operand.hbm [shape: f32[1,128], index: 9, kind: output, shape index: {}]  }
   0x1   :  { %v761_v0 = vld [vmem:[%s1018_s0] sm:$0xff]   ;;  %v763_v2 = vld [vmem:[%s1019_s1 + $0x8] sm:$0xff]   ;;  %759 = vset.pattern.permute.xlu0 %v800_v3  ;;  %v764_v4 = vld [vmem:[%s1019_s1 + $0x10] sm:$0xff]   ;;  %760 = vset.pattern.permute.xlu1 %v800_v3 }
   0x2   :  { %v762_v1 = vld [vmem:[%s1019_s1] sm:$0xff]   ;;  %703 = vmatprep.subr.bf16.mxu0 %v761_v0  ;;  %v55_v6 = vld [vmem:[%s1020_s2 + $0x10] sm:$0xff]  ;;  %v54_v7 = vld [vmem:[%s1020_s2 + $0x8] sm:$0xff] }
   0x3   :  { %704 = vmatpush3.bf16.msra.mxu0 %v761_v0  ;;  %705 = vmatprep.mubr.msk.bf16.mxu0 %vm195_vm0, %v762_v1  ;;  %v53_v5 = vld [vmem:[%s1020_s2] sm:$0xff]  ;;  %v765_v8 = vld [vmem:[%s1019_s1 + $0x18] sm:$0xff]   ;;  %v58_v12 = vld [vmem:[%s1020_s2 + $0x28] sm:$0xff] }
   0x4   :  { %71 = vperm.xlu0 %759, %v53_v5   ;;  %81 = vperm.xlu1 %760, %v55_v6   ;;  %v766_v9 = vld [vmem:[%s1019_s1 + $0x20] sm:$0xff]   ;;  %v56_v10 = vld [vmem:[%s1020_s2 + $0x18] sm:$0xff]  ;;  %v59_v13 = vld [vmem:[%s1020_s2 + $0x30] sm:$0xff] }
   0x5   :  { %v57_v11 = vld [vmem:[%s1020_s2 + $0x20] sm:$0xff]  ;;  %v767_v14 = vld [vmem:[%s1019_s1 + $0x28] sm:$0xff]   ;;  %v768_v15 = vld [vmem:[%s1019_s1 + $0x30] sm:$0xff]  }
   0x6   :  { %706 = vmatmul.mubr.msk.bf16.vlgmr.msra.gmra.mrb[0].mxu0 %vm195_vm0, %v763_v2  ;;  %v60_v16 = vld [vmem:[%s1020_s2 + $0x38] sm:$0xff]  ;;  %v61_v17 = vld [vmem:[%s1020_s2 + $0x40] sm:$0xff]  ;;  %v62_v18 = vld [vmem:[%s1020_s2 + $0x48] sm:$0xff] }
   0x7   :  { %709 = vmatprep.mubr.msk.bf16.mxu0 %vm195_vm0, %v764_v4 }
   0x8   :  { %76 = vperm.xlu0 %759, %v54_v7   ;;  %86 = vperm.xlu1 %760, %v56_v10  }
   0xc   :  { %91 = vperm.xlu0 %759, %v57_v11   ;;  %96 = vperm.xlu1 %760, %v58_v12  }
   0xe   :  { %710 = vmatmul.mubr.msk.bf16.gmra.mrb[4].mxu0 %vm195_vm0, %v765_v8 }
   0xf   :  { %713 = vmatprep.mubr.msk.bf16.mxu0 %vm195_vm0, %v766_v9 }
  0x10   :  { %101 = vperm.xlu0 %759, %v59_v13   ;;  %106 = vperm.xlu1 %760, %v60_v16  }
  0x16   :  { %714 = vmatmul.mubr.msk.bf16.gmra.mrb[8].mxu0 %vm195_vm0, %v767_v14 }
  0x17   :  { %717 = vmatprep.mubr.msk.bf16.mxu0 %vm195_vm0, %v768_v15 }
  0x18   :  { %15 = vsyncpa [#allocation4], 0  ;;  %111 = vperm.xlu0 %759, %v61_v17   ;;  %v63_v19 = vld [vmem:[%s1020_s2 + $0x50] sm:$0xff]  ;;  %v769_v20 = vld [vmem:[%s1019_s1 + $0x38] sm:$0xff]   ;;  %116 = vperm.xlu1 %760, %v62_v18   ;;  %vm536_vm1 = vcmask 523264   ;;  %s801_s29 = smov [#allocation3]  }
  0x19   :  { %v64_v21 = vld [vmem:[%s1020_s2 + $0x58] sm:$0xff]  ;;  %v65_v22 = vld [vmem:[%s1020_s2 + $0x60] sm:$0xff]  ;;  %v66_v23 = vld [vmem:[%s1020_s2 + $0x68] sm:$0xff]  ;;  %s643_s30 = sshll.u32 %s801_s29, 4  ;;  %s644_s30 = int_to_ptr.vmem [resolvable:$true] %s643_s30 }
  0x1a   :  { %v67_v24 = vld [vmem:[%s1020_s2 + $0x70] sm:$0xff]  ;;  %v68_v25 = vld [vmem:[%s1020_s2 + $0x78] sm:$0xff]  ;;  %v349_v26 = vld [vmem:[%s1022_s4] sm:$0xff]  ;;  %s776_s10 = scalar_lea.vmem %s644_s30, 16  ;;  %s780_s11 = scalar_lea.vmem %s644_s30, 32 }
  0x1b   :  { %v350_v27 = vld [vmem:[%s1022_s4 + $0x8] sm:$0xff]  ;;  %v351_v28 = vld [vmem:[%s1022_s4 + $0x10] sm:$0xff]  ;;  %v352_v29 = vld [vmem:[%s1022_s4 + $0x18] sm:$0xff]  ;;  %p777_p0 = scmp.ne.s32.totalorder %s644_s30, %s776_s10  ;;  %p781_p1 = scmp.lt.s32.totalorder %s644_s30, %s644_s30 }
  0x1c   :  { %121 = vperm.xlu0 %759, %v63_v19   ;;  %126 = vperm.xlu1 %760, %v64_v21   ;;  %v353_v30 = vld [vmem:[%s1022_s4 + $0x20] sm:$0xff]  ;;  %v354_v31 = vld [vmem:[%s1022_s4 + $0x28] sm:$0xff]  ;;  %v355_v32 = vld [vmem:[%s1022_s4 + $0x30] sm:$0xff]  ;;  %p782_p2 = scmp.lt.s32.totalorder %s780_s11, %s776_s10 }
  0x1d   :  { %v356_v33 = vld [vmem:[%s1022_s4 + $0x38] sm:$0xff]  ;;  %v502_v34 = vld [vmem:[%s1024_s6] sm:$0xff]  ;;  %v503_v35 = vld [vmem:[%s1024_s6 + $0x8] sm:$0xff] }
  0x1e   :  { %718 = vmatmul.mubr.msk.bf16.gmra.mrb[12].mxu0 %vm195_vm0, %v769_v20  ;;  %v504_v36 = vld [vmem:[%s1024_s6 + $0x10] sm:$0xff]  ;;  %v505_v37 = vld [vmem:[%s1024_s6 + $0x18] sm:$0xff]  ;;  %v596_v38 = vld [vmem:[%s1025_s7] sm:$0xff]  ;;  %p783_p3 = por %p782_p2, %p781_p1 }
  0x1f   :  { %v597_v39 = vld [vmem:[%s1025_s7 + $0x8] sm:$0xff]  ;;  %v598_v40 = vld [vmem:[%s1025_s7 + $0x10] sm:$0xff]  ;;  %v599_v41 = vld [vmem:[%s1025_s7 + $0x18] sm:$0xff] }
  0x20   :  { %131 = vperm.xlu0 %759, %v65_v22   ;;  %136 = vperm.xlu1 %760, %v66_v23   ;;  %v770_v42 = vld [vmem:[%s1021_s3] sm:$0xff]   ;;  %p784_p4 = pnand %p783_p3, %p777_p0 }
  0x21   :  { %737 = vmatprep.mubr.bf16.mxu1 %v770_v42 }
  0x24   :  { %141 = vperm.xlu0 %759, %v67_v24   ;;  %146 = vperm.xlu1 %760, %v68_v25  }
  0x28   :  { %359 = vperm.xlu0 %759, %v349_v26   ;;  %364 = vperm.xlu1 %760, %v350_v27  }
  0x2c   :  { %369 = vperm.xlu0 %759, %v351_v28   ;;  %374 = vperm.xlu1 %760, %v352_v29  }
  0x30   :  { %379 = vperm.xlu0 %759, %v353_v30   ;;  %384 = vperm.xlu1 %760, %v354_v31  }
  0x34   :  { %389 = vperm.xlu0 %759, %v355_v32   ;;  %394 = vperm.xlu1 %760, %v356_v33  }
  0x38   :  { %508 = vperm.xlu0 %759, %v502_v34   ;;  %513 = vperm.xlu1 %760, %v503_v35  }
  0x3c   :  { %518 = vperm.xlu0 %759, %v504_v36   ;;  %523 = vperm.xlu1 %760, %v505_v37  }
  0x40   :  { %602 = vperm.xlu0 %759, %v596_v38   ;;  %607 = vperm.xlu1 %760, %v597_v39  }
  0x44   :  { %612 = vperm.xlu0 %759, %v598_v40   ;;  %617 = vperm.xlu1 %760, %v599_v41  }
  0x83   :  { %v72_v43 = vpop.permute.xlu0 %71  ;;  %v82_v44 = vpop.permute.xlu1 %81 }
  0x87   :  { %v77_v45 = vpop.permute.xlu0 %76  ;;  %v87_v46 = vpop.permute.xlu1 %86 }
  0x8b   :  { %v92_v47 = vpop.permute.xlu0 %91  ;;  %v97_v48 = vpop.permute.xlu1 %96 }
  0x8f   :  { %v102_v49 = vpop.permute.xlu0 %101  ;;  %v107_v53 = vpop.permute.xlu1 %106 }
  0x97   :  { %v112_v61 = vpop.permute.xlu0 %111  ;;  %v117_v1 = vpop.permute.xlu1 %116 }
  0x9b   :  { %v122_v10 = vpop.permute.xlu0 %121  ;;  %v127_v14 = vpop.permute.xlu1 %126 }
  0x9f   :  { %v132_v22 = vpop.permute.xlu0 %131  ;;  %v137_v27 = vpop.permute.xlu1 %136 }
  0xa3   :  { %v142_v34 = vpop.permute.xlu0 %141  ;;  %v147_v39 = vpop.permute.xlu1 %146 }
  0xd9   :  { %v707_v50 = vpop.f32.mrb[0].mxu0 }
  0xda   :  { %v263_v51 = vadd.f32 %v707_v50, %v82_v44  ;;  %v254_v52 = vpop.f32.mrb[1].mxu0 }
  0xdb   :  { %v255_v54 = vadd.f32 %v254_v52, %v72_v43  ;;  %v708_v55 = vpop.f32.mrb[2].mxu0  ;;  %v772_v52 = vld [vmem:[%s1021_s3 + $0x10] sm:$0xff]  }
  0xdc   :  { %v266_v56 = vadd.f32 %v708_v55, %v87_v46  ;;  %v257_v57 = vpop.f32.mrb[3].mxu0  ;;  %v319_v59 = vmax.f32 %v263_v51, 0.0  ;;  %v771_v51 = vld [vmem:[%s1021_s3 + $0x8] sm:$0xff]   ;;  %v360_v55 = vpop.permute.xlu0 %359 }
  0xdd   :  { %v258_v58 = vadd.f32 %v257_v57, %v77_v45  ;;  %v317_v62 = vmax.f32 %v255_v54, 0.0  ;;  %v774_v54 = vld [vmem:[%s1023_s5] sm:$0xff]  }
  0xde   :  { %v320_v60 = vmax.f32 %v266_v56, 0.0  ;;  %753 = vmatprep.mubr.msk.bf16.mxu0 %vm536_vm1, %v774_v54  ;;  %v365_v56 = vpop.permute.xlu1 %364 }
  0xdf   :  { %v318_v63 = vmax.f32 %v258_v58, 0.0 }
  0xe0   :  { %v342_v0 = vpack.c.bf16 %v320_v60, %v319_v59  ;;  %v370_v57 = vpop.permute.xlu0 %369 }
  0xe1   :  { %v711_v2 = vpop.f32.mrb[4].mxu0  ;;  %v341_v3 = vpack.c.bf16 %v318_v63, %v317_v62 }
  0xe2   :  { %v279_v4 = vadd.f32 %v711_v2, %v102_v49  ;;  %v270_v5 = vpop.f32.mrb[5].mxu0  ;;  %v375_v58 = vpop.permute.xlu1 %374 }
  0xe3   :  { %v271_v6 = vadd.f32 %v270_v5, %v92_v47  ;;  %v712_v7 = vpop.f32.mrb[6].mxu0  ;;  %721 = vmatprep.subr.bf16.mxu1 %v341_v3 }
  0xe4   :  { %v282_v8 = vadd.f32 %v712_v7, %v107_v53  ;;  %v273_v9 = vpop.f32.mrb[7].mxu0  ;;  %722 = vmatpush3.bf16.msra.mxu1 %v341_v3  ;;  %v323_v12 = vmax.f32 %v279_v4, 0.0  ;;  %v773_v53 = vld [vmem:[%s1021_s3 + $0x18] sm:$0xff]   ;;  %v380_v62 = vpop.permute.xlu0 %379 }
  0xe5   :  { %v274_v11 = vadd.f32 %v273_v9, %v97_v48  ;;  %723 = vmatprep.subr.bf16.mxu1 %v342_v0  ;;  %v321_v15 = vmax.f32 %v271_v6, 0.0 }
  0xe6   :  { %v324_v13 = vmax.f32 %v282_v8, 0.0  ;;  %v385_v3 = vpop.permute.xlu1 %384 }
  0xe7   :  { %v322_v16 = vmax.f32 %v274_v11, 0.0 }
  0xe8   :  { %v344_v17 = vpack.c.bf16 %v324_v13, %v323_v12  ;;  %724 = vmatpush3.bf16.msra.mxu1 %v342_v0 }
  0xe9   :  { %v343_v18 = vpack.c.bf16 %v322_v16, %v321_v15  ;;  %v715_v19 = vpop.f32.mrb[8].mxu0 }
  0xea   :  { %v295_v20 = vadd.f32 %v715_v19, %v122_v10  ;;  %v286_v21 = vpop.f32.mrb[9].mxu0  ;;  %v390_v10 = vpop.permute.xlu0 %389 }
  0xeb   :  { %v287_v23 = vadd.f32 %v286_v21, %v112_v61  ;;  %v716_v24 = vpop.f32.mrb[10].mxu0  ;;  %725 = vmatprep.subr.bf16.mxu1 %v343_v18  ;;  %v395_v15 = vpop.permute.xlu1 %394 }
  0xec   :  { %v298_v25 = vadd.f32 %v716_v24, %v127_v14  ;;  %v289_v26 = vpop.f32.mrb[11].mxu0  ;;  %726 = vmatpush3.bf16.msra.mxu1 %v343_v18  ;;  %v327_v29 = vmax.f32 %v295_v20, 0.0 }
  0xed   :  { %v290_v28 = vadd.f32 %v289_v26, %v117_v1  ;;  %727 = vmatprep.subr.bf16.mxu1 %v344_v17  ;;  %v325_v31 = vmax.f32 %v287_v23, 0.0 }
  0xee   :  { %v328_v30 = vmax.f32 %v298_v25, 0.0 }
  0xef   :  { %v326_v32 = vmax.f32 %v290_v28, 0.0  ;;  %v509_v28 = vpop.permute.xlu0 %508 }
  0xf0   :  { %v346_v33 = vpack.c.bf16 %v328_v30, %v327_v29  ;;  %728 = vmatpush3.bf16.msra.mxu1 %v344_v17  ;;  %v514_v29 = vpop.permute.xlu1 %513 }
  0xf1   :  { %v345_v35 = vpack.c.bf16 %v326_v32, %v325_v31  ;;  %v719_v36 = vpop.f32.mrb[12].mxu0 }
  0xf2   :  { %v311_v37 = vadd.f32 %v719_v36, %v142_v34  ;;  %v302_v38 = vpop.f32.mrb[13].mxu0 }
  0xf3   :  { %v303_v40 = vadd.f32 %v302_v38, %v132_v22  ;;  %v720_v41 = vpop.f32.mrb[14].mxu0  ;;  %729 = vmatprep.subr.bf16.mxu1 %v345_v35  ;;  %v519_v30 = vpop.permute.xlu0 %518 }
  0xf4   :  { %v314_v42 = vadd.f32 %v720_v41, %v147_v39  ;;  %v305_v43 = vpop.f32.mrb[15].mxu0  ;;  %730 = vmatpush3.bf16.msra.mxu1 %v345_v35  ;;  %v331_v45 = vmax.f32 %v311_v37, 0.0  ;;  %v524_v31 = vpop.permute.xlu1 %523 }
  0xf5   :  { %v306_v44 = vadd.f32 %v305_v43, %v137_v27  ;;  %731 = vmatprep.subr.bf16.mxu1 %v346_v33  ;;  %v329_v47 = vmax.f32 %v303_v40, 0.0  ;;  %v775_v27 = vld [vmem:[%s1023_s5 + $0x8] sm:$0xff]  }
  0xf6   :  { %v332_v46 = vmax.f32 %v314_v42, 0.0 }
  0xf7   :  { %v330_v48 = vmax.f32 %v306_v44, 0.0  ;;  %v603_v37 = vpop.permute.xlu0 %602 }
  0xf8   :  { %v348_v49 = vpack.c.bf16 %v332_v46, %v331_v45  ;;  %732 = vmatpush3.bf16.msra.mxu1 %v346_v33  ;;  %v608_v42 = vpop.permute.xlu1 %607 }
  0xf9   :  { %v347_v50 = vpack.c.bf16 %v330_v48, %v329_v47 }
  0xfb   :  { %733 = vmatprep.subr.bf16.mxu1 %v347_v50  ;;  %v613_v48 = vpop.permute.xlu0 %612 }
  0xfc   :  { %734 = vmatpush3.bf16.msra.mxu1 %v347_v50 }
  0xfd   :  { %735 = vmatprep.subr.bf16.mxu1 %v348_v49 }
 0x100   :  { %736 = vmatpush3.bf16.msra.mxu1 %v348_v49 }
 0x103   :  { %738 = vmatmul.mubr.bf16.vlgmr.msra.gmra.mrb[0].mxu1 %v771_v51  ;;  %v618_v51 = vpop.permute.xlu1 %617 }
 0x104   :  { %741 = vmatprep.mubr.bf16.mxu1 %v772_v52 }
 0x10b   :  { %742 = vmatmul.mubr.bf16.gmra.mrb[4].mxu1 %v773_v53 }
 0x1d6   :  { %v739_v59 = vpop.f32.mrb[0].mxu1 }
 0x1d7   :  { %v464_v60 = vadd.f32 %v739_v59, %v370_v57  ;;  %v455_v61 = vpop.f32.mrb[1].mxu1 }
 0x1d8   :  { %v456_v63 = vadd.f32 %v455_v61, %v360_v55  ;;  %v740_v0 = vpop.f32.mrb[2].mxu1 }
 0x1d9   :  { %v467_v1 = vadd.f32 %v740_v0, %v375_v58  ;;  %v458_v2 = vpop.f32.mrb[3].mxu1  ;;  %v488_v5 = vmax.f32 %v464_v60, 0.0  ;;  %v634_v60 = vstv %s1026_s8 }
 0x1da   :  { %v459_v4 = vadd.f32 %v458_v2, %v365_v56  ;;  %v486_v7 = vmax.f32 %v456_v63, 0.0 }
 0x1db   :  { %v489_v6 = vmax.f32 %v467_v1, 0.0 }
 0x1dc   :  { %v487_v8 = vmax.f32 %v459_v4, 0.0 }
 0x1dd   :  { %v499_v9 = vpack.c.bf16 %v489_v6, %v488_v5 }
 0x1de   :  { %v498_v11 = vpack.c.bf16 %v487_v8, %v486_v7  ;;  %v743_v12 = vpop.f32.mrb[4].mxu1 }
 0x1df   :  { %v480_v13 = vadd.f32 %v743_v12, %v390_v10  ;;  %v471_v14 = vpop.f32.mrb[5].mxu1 }
 0x1e0   :  { %v472_v16 = vadd.f32 %v471_v14, %v380_v62  ;;  %v744_v17 = vpop.f32.mrb[6].mxu1  ;;  %745 = vmatprep.subr.bf16.mxu0 %v498_v11 }
 0x1e1   :  { %v483_v18 = vadd.f32 %v744_v17, %v395_v15  ;;  %v474_v19 = vpop.f32.mrb[7].mxu1  ;;  %746 = vmatpush3.bf16.msra.mxu0 %v498_v11  ;;  %v492_v21 = vmax.f32 %v480_v13, 0.0 }
 0x1e2   :  { %v475_v20 = vadd.f32 %v474_v19, %v385_v3  ;;  %747 = vmatprep.subr.bf16.mxu0 %v499_v9  ;;  %v490_v23 = vmax.f32 %v472_v16, 0.0 }
 0x1e3   :  { %v493_v22 = vmax.f32 %v483_v18, 0.0 }
 0x1e4   :  { %v491_v24 = vmax.f32 %v475_v20, 0.0 }
 0x1e5   :  { %v501_v25 = vpack.c.bf16 %v493_v22, %v492_v21  ;;  %748 = vmatpush3.bf16.msra.mxu0 %v499_v9 }
 0x1e6   :  { %v500_v26 = vpack.c.bf16 %v491_v24, %v490_v23 }
 0x1e8   :  { %749 = vmatprep.subr.bf16.mxu0 %v500_v26 }
 0x1e9   :  { %750 = vmatpush3.bf16.msra.mxu0 %v500_v26 }
 0x1ea   :  { %751 = vmatprep.subr.bf16.mxu0 %v501_v25 }
 0x1ed   :  { %752 = vmatpush3.bf16.msra.mxu0 %v501_v25 }
 0x1f0   :  { %754 = vmatmul.mubr.msk.bf16.vlgmr.msra.gmra.mrb[16].mxu0 %vm536_vm1, %v775_v27 }
 0x2c3   :  { %v755_v32 = vpop.f32.mrb[16].mxu0 }
 0x2c4   :  { %v577_v33 = vpop.f32.mrb[17].mxu0  ;;  %v586_v34 = vadd.f32 %v755_v32, %v519_v30 }
 0x2c5   :  { %v578_v35 = vadd.f32 %v577_v33, %v509_v28  ;;  %v756_v36 = vpop.f32.mrb[18].mxu0 }
 0x2c6   :  { %v580_v38 = vpop.f32.mrb[19].mxu0  ;;  %v589_v40 = vadd.f32 %v756_v36, %v524_v31  ;;  %v594_v43 = vmax.f32 %v586_v34, 0.0 }
 0x2c7   :  { %v592_v39 = vmax.f32 %v578_v35, 0.0  ;;  %v581_v41 = vadd.f32 %v580_v38, %v514_v29 }
 0x2c8   :  { %v595_v46 = vmax.f32 %v589_v40, 0.0  ;;  %v622_v49 = vmul.f32 %v613_v48, %v594_v43 }
 0x2c9   :  { %v593_v44 = vmax.f32 %v581_v41, 0.0  ;;  %v620_v45 = vmul.f32 %v603_v37, %v592_v39 }
 0x2ca   :  { %v623_v52 = vmul.f32 %v618_v51, %v595_v46 }
 0x2cb   :  { %v621_v47 = vmul.f32 %v608_v42, %v593_v44 }
 0x2cd   :  { %v624_v50 = vadd.f32 %v621_v47, %v620_v45 }
 0x2cf   :  { %v625_v53 = vadd.f32 %v624_v50, %v622_v49 }
 0x2d1   :  { %v626_v54 = vadd.f32 %v625_v53, %v623_v52 }
 0x2d3   :  { %v627_v55 = vrot.slane %v626_v54, 4 }
 0x2d5   :  { %v628_v56 = vadd.f32 %v627_v55, %v626_v54 }
 0x2d7   :  { %v629_v57 = vrot.slane %v628_v56, 2 }
 0x2d9   :  { %v630_v58 = vadd.f32 %v629_v57, %v628_v56 }
 0x2db   :  { %v631_v59 = vrot.slane %v630_v58, 1 }
 0x2dd   :  { %v632_v61 = vadd.f32 %v631_v59, %v630_v58 }
 0x2df   :  { %v635_v62 = vadd.f32 %v634_v60, %v632_v61 }
 0x2e1   :  { %636 = vst [vmem:[#allocation3] sm:$0x1] %v635_v62 }
 0x2e2   :  { %787 = shalt.err (!%p784_p4)
}
 0x2e3   :  { %s788_s13 = scalar_lea.hbm %s1027_s9, 16 }
 0x2e4   :  { %p789_p5 = scmp.ne.s32.totalorder %s1027_s9, %s788_s13  ;;  %p792_p6 = scmp.lt.u32.totalorder %s788_s13, %s1027_s9 }
 0x2e6   :  { %p794_p7 = pnand %p792_p6, %p789_p5 }
 0x2e8   :  { %797 = shalt.err (!%p794_p7)
}
 0x2e9   :  { %646 = dma.vmem_to_hbm [thread:$0]  %s644_s30, 16, %s1027_s9, [#allocation4]  }
 0x2ea   :  { %798 = dma.done.wait [#allocation4], 16  }
 0x2eb   :  { %799 = vsyncadd [#allocation4], 4294967280 }
 0x2ec   :  { %650 = vsyncpa [#allocation4], 1 }

</bundles_post_ra>
